<compile_context>
chip_gen: v7x
topology: tpu7x:2x2x1
jax: 0.10.0
libtpu: 0.0.40
codegen_flags: <defaults>
</compile_context>

<pallas_src>
import functools

import jax
import jax.numpy as jnp
from jax.experimental import pallas as pl
from jax.experimental.pallas import tpu as pltpu


def attention_kernel(h_ref, e_ref, w1t_ref, b1w2_ref, b2_ref, o_ref, *, two_h):
    # First layer with the concat eliminated (two accumulating MXU dots):
    #   z = h @ W1_h^T + e @ W1_e^T + b1                    -> (row_tile, H)
    z = jnp.dot(h_ref[...], w1t_ref[:two_h, :], preferred_element_type=jnp.float32)
    z = z + jnp.dot(e_ref[...], w1t_ref[two_h:, :], preferred_element_type=jnp.float32)
    z = z + b1w2_ref[0:1, :]                 # b1 row, broadcast over sublanes (rows)
    a = jnp.tanh(z)                          # EUP transcendental
    # Second layer Linear(H, 1): VPU multiply + lane (XLU) reduction; kernel is
    # HBM-bound so this is free filler.  b2 is a true scalar read from SMEM.
    s = jnp.sum(a * b1w2_ref[1:2, :], axis=1, keepdims=True) + b2_ref[0, 0]
    o_ref[...] = s.astype(o_ref.dtype)       # (row_tile, 1)


def attention_forward(hidden, encoder_state, w1, b1, w2, b2, *, max_row_tile=2048):
    """hidden / encoder_state: (N, 2H); w1: (H, 4H); b1: (H,); w2: (1, H); b2: (1,)."""
    n, two_h = hidden.shape
    h_dim = w1.shape[0]
    assert w1.shape == (h_dim, 2 * two_h)
    assert encoder_state.shape == (n, two_h)

    # Tiny parameter relayout only — the big (N, 2H) activations are consumed as-is
    # (no transpose / pad copies through HBM).
    w1_t = jnp.transpose(w1)                              # (4H, H): [W1_h^T; W1_e^T]
    b1w2 = jnp.stack([b1, w2.reshape(h_dim)], axis=0)     # (2, H): row0 = b1, row1 = w2
    b2_smem = b2.reshape(1, 1)                            # scalar, lives in SMEM

    # Row tile: multiple of 128, large (up to max_row_tile) to approach the HBM
    # roofline and amortize the ~0.35us grid-step overhead, but capped so the grid
    # keeps >= 2 balanced steps for v7x's two TensorCores.
    row_tile = max(128, min(max_row_tile, ((pl.cdiv(n, 2) + 127) // 128) * 128))
    n_tiles = pl.cdiv(n, row_tile)          # ragged tail handled by Pallas masking

    cost = pl.CostEstimate(
        flops=2 * n * (2 * two_h) * h_dim + 3 * n * h_dim,
        transcendentals=n * h_dim,
        bytes_accessed=4 * (2 * n * two_h + 2 * two_h * h_dim + 2 * h_dim + 1 + n),
    )

    kernel = functools.partial(attention_kernel, two_h=two_h)

    return pl.pallas_call(
        kernel,
        out_shape=jax.ShapeDtypeStruct((n, 1), jnp.float32),
        grid=(n_tiles,),
        in_specs=[
            pl.BlockSpec((row_tile, two_h), lambda i: (i, 0)),    # hidden rows (pipelined)
            pl.BlockSpec((row_tile, two_h), lambda i: (i, 0)),    # encoder rows (pipelined)
            pl.BlockSpec((2 * two_h, h_dim), lambda i: (0, 0)),   # W1^T (VMEM-resident)
            pl.BlockSpec((2, h_dim), lambda i: (0, 0)),           # [b1; w2] (VMEM-resident)
            pl.BlockSpec(memory_space=pltpu.MemorySpace.SMEM),    # b2 scalar
        ],
        out_specs=pl.BlockSpec((row_tile, 1), lambda i: (i, 0)),  # module's (N, 1) layout
        compiler_params=pltpu.CompilerParams(
            dimension_semantics=("parallel",),
            vmem_limit_bytes=32 * 1024 * 1024,  # explicit: v5e scoped default is 16 MiB
        ),
        cost_estimate=cost,
    )(hidden, encoder_state, w1_t, b1w2, b2_smem)


def reference_forward(hidden, encoder_state, w1, b1, w2, b2):
    x = jnp.concatenate([hidden, encoder_state], axis=1)
    z = jnp.tanh(jnp.dot(x, w1.T, precision=jax.lax.Precision.HIGHEST) + b1)
    return jnp.dot(z, w2.T, precision=jax.lax.Precision.HIGHEST) + b2


if __name__ == "__main__":
    hidden_size = 32                 # H
    batch = 2
    src_len = 128
    n_rows = batch * src_len         # all (decoder, encoder-position) pairs of one step

    key = jax.random.PRNGKey(0)
    k_h, k_e, k_w1, k_b1, k_w2, k_b2 = jax.random.split(key, 6)

    # Inputs: hidden and encoder_state each (N, 2H) so their concat is (N, 4H).
    hidden = jax.random.normal(k_h, (n_rows, 2 * hidden_size), dtype=jnp.float32)
    encoder_state = jax.random.normal(k_e, (n_rows, 2 * hidden_size), dtype=jnp.float32)

    # Parameters in native nn.Linear layout: weight (out, in), bias (out,).
    bound1 = 1.0 / jnp.sqrt(4.0 * hidden_size)
    w1 = jax.random.uniform(k_w1, (hidden_size, 4 * hidden_size),
                            minval=-bound1, maxval=bound1, dtype=jnp.float32)
    b1 = jax.random.uniform(k_b1, (hidden_size,),
                            minval=-bound1, maxval=bound1, dtype=jnp.float32)

    bound2 = 1.0 / jnp.sqrt(float(hidden_size))
    w2 = jax.random.uniform(k_w2, (1, hidden_size),
                            minval=-bound2, maxval=bound2, dtype=jnp.float32)
    b2 = jax.random.uniform(k_b2, (1,),
                            minval=-bound2, maxval=bound2, dtype=jnp.float32)

    out = attention_forward(hidden, encoder_state, w1, b1, w2, b2)
    out = jax.block_until_ready(out)

    ref = reference_forward(hidden, encoder_state, w1, b1, w2, b2)
    assert out.shape == (n_rows, 1), out.shape
    assert jnp.allclose(out, ref, atol=1e-5, rtol=1e-5), "mismatch vs reference"

    print("KERNEL_OK")
</pallas_src>

<mosaic_0001>
module attributes {stable_mosaic.version = 11 : i64} {
  func.func @attention_kernel(%arg0: i32, %arg1: memref<128x64xf32, #tpu.memory_space<vmem>>, %arg2: memref<128x64xf32, #tpu.memory_space<vmem>>, %arg3: memref<128x32xf32, #tpu.memory_space<vmem>>, %arg4: memref<2x32xf32, #tpu.memory_space<vmem>>, %arg5: memref<1x1xf32, #tpu.memory_space<smem>>, %arg6: memref<128x1xf32, #tpu.memory_space<vmem>>) attributes {dimension_semantics = [#tpu.dimension_semantics<parallel>], iteration_bounds = array<i64: 2>, scalar_prefetch = 0 : i64, scratch_operands = 0 : i64, tpu.core_type = #tpu.core_type<tc>, window_params = [{transform_indices = @transform_0, window_bounds = array<i64: 128, 64>}, {transform_indices = @transform_1, window_bounds = array<i64: 128, 64>}, {pipeline_mode = #tpu.pipeline_mode<synchronous>, transform_indices = @transform_2, window_bounds = array<i64: 128, 32>}, {pipeline_mode = #tpu.pipeline_mode<synchronous>, transform_indices = @transform_3, window_bounds = array<i64: 2, 32>}, {transform_indices = @transform_4, window_bounds = array<i64: 1, 1>}, {transform_indices = @transform_5, window_bounds = array<i64: 128, 1>}]} {
    %c0 = arith.constant 0 : index
    %c0_0 = arith.constant 0 : index
    %0 = vector.load %arg1[%c0, %c0_0] : memref<128x64xf32, #tpu.memory_space<vmem>>, vector<128x64xf32>
    %c0_1 = arith.constant 0 : index
    %c0_2 = arith.constant 0 : index
    %1 = vector.load %arg3[%c0_1, %c0_2] : memref<128x32xf32, #tpu.memory_space<vmem>>, vector<64x32xf32>
    %cst = arith.constant dense<0.000000e+00> : vector<128x32xf32>
    %2 = tpu.matmul %0, %1, %cst {dimension_numbers = #tpu.dot_dimension_numbers<[1], [0], [0], [1], [0, 0, 1, 1], [], []>} : vector<128x64xf32>, vector<64x32xf32>, vector<128x32xf32> -> vector<128x32xf32>
    %c0_3 = arith.constant 0 : index
    %c0_4 = arith.constant 0 : index
    %3 = vector.load %arg2[%c0_3, %c0_4] : memref<128x64xf32, #tpu.memory_space<vmem>>, vector<128x64xf32>
    %c64 = arith.constant 64 : index
    %c0_5 = arith.constant 0 : index
    %4 = vector.load %arg3[%c64, %c0_5] : memref<128x32xf32, #tpu.memory_space<vmem>>, vector<64x32xf32>
    %cst_6 = arith.constant dense<0.000000e+00> : vector<128x32xf32>
    %5 = tpu.matmul %3, %4, %cst_6 {dimension_numbers = #tpu.dot_dimension_numbers<[1], [0], [0], [1], [0, 0, 1, 1], [], []>} : vector<128x64xf32>, vector<64x32xf32>, vector<128x32xf32> -> vector<128x32xf32>
    %6 = arith.addf %2, %5 : vector<128x32xf32>
    %c0_7 = arith.constant 0 : index
    %c0_8 = arith.constant 0 : index
    %7 = vector.load %arg4[%c0_7, %c0_8] : memref<2x32xf32, #tpu.memory_space<vmem>>, vector<1x32xf32>
    %8 = vector.broadcast %7 : vector<1x32xf32> to vector<128x32xf32>
    %9 = arith.addf %6, %8 : vector<128x32xf32>
    %10 = math.tanh %9 : vector<128x32xf32>
    %c1 = arith.constant 1 : index
    %c0_9 = arith.constant 0 : index
    %11 = vector.load %arg4[%c1, %c0_9] : memref<2x32xf32, #tpu.memory_space<vmem>>, vector<1x32xf32>
    %12 = vector.broadcast %11 : vector<1x32xf32> to vector<128x32xf32>
    %13 = arith.mulf %10, %12 : vector<128x32xf32>
    %cst_10 = arith.constant dense<0.000000e+00> : vector<128xf32>
    %14 = vector.multi_reduction <add>, %13, %cst_10 [1] : vector<128x32xf32> to vector<128xf32>
    %15 = vector.shape_cast %14 : vector<128xf32> to vector<128x1xf32>
    %c0_11 = arith.constant 0 : index
    %c0_12 = arith.constant 0 : index
    %16 = memref.load %arg5[%c0_11, %c0_12] : memref<1x1xf32, #tpu.memory_space<smem>>
    %17 = vector.broadcast %16 : f32 to vector<128x1xf32>
    %18 = arith.addf %15, %17 : vector<128x1xf32>
    %c0_13 = arith.constant 0 : index
    %c0_14 = arith.constant 0 : index
    %19 = vector.load %arg6[%c0_13, %c0_14] : memref<128x1xf32, #tpu.memory_space<vmem>>, vector<128x1xf32>
    tpu.vector_store %arg6[%c0_13, %c0_14], %18 {strides = array<i32>} : memref<128x1xf32, #tpu.memory_space<vmem>>, vector<128x1xf32>,
    return
  }
  func.func @transform_0(%arg0: i32) -> (i32, i32) {
    %c0_i32 = arith.constant 0 : i32
    %c0_i32_0 = arith.constant 0 : i32
    return %arg0, %c0_i32 : i32, i32
  }
  func.func @transform_1(%arg0: i32) -> (i32, i32) {
    %c0_i32 = arith.constant 0 : i32
    %c0_i32_0 = arith.constant 0 : i32
    return %arg0, %c0_i32 : i32, i32
  }
  func.func @transform_2(%arg0: i32) -> (i32, i32) {
    %c0_i32 = arith.constant 0 : i32
    %c0_i32_0 = arith.constant 0 : i32
    %c0_i32_1 = arith.constant 0 : i32
    return %c0_i32, %c0_i32_0 : i32, i32
  }
  func.func @transform_3(%arg0: i32) -> (i32, i32) {
    %c0_i32 = arith.constant 0 : i32
    %c0_i32_0 = arith.constant 0 : i32
    %c0_i32_1 = arith.constant 0 : i32
    return %c0_i32, %c0_i32_0 : i32, i32
  }
  func.func @transform_4(%arg0: i32) -> (i32, i32) {
    %c0_i32 = arith.constant 0 : i32
    %c0_i32_0 = arith.constant 0 : i32
    %c0_i32_1 = arith.constant 0 : i32
    return %c0_i32, %c0_i32_0 : i32, i32
  }
  func.func @transform_5(%arg0: i32) -> (i32, i32) {
    %c0_i32 = arith.constant 0 : i32
    %c0_i32_0 = arith.constant 0 : i32
    return %arg0, %c0_i32 : i32, i32
  }
}

</mosaic_0001>

<bundles_post_ra>
// kernel: tpu_custom_call.1
= control target key start
LH: loop header
LB: loop body
LE: loop exit
PB: predicated region body
PF: predicated region fallthrough
CT: control target
= control target key end

     0   :  { %s1200_s20 = smov 0   ;;  %s1433_s0 = inlined_call_operand.vmem [shape: f32[256,64], index: 0, kind: input, shape index: {}]   ;;  %s1434_s1 = inlined_call_operand.vmem [shape: f32[256,64], index: 1, kind: input, shape index: {}]   ;;  %s1435_s2 = inlined_call_operand.vmem [shape: f32[128,32], index: 2, kind: input, shape index: {}]   ;;  %s1436_s3 = inlined_call_operand.vmem [shape: f32[2,32], index: 3, kind: input, shape index: {}]   ;;  %s1437_s4 = inlined_call_operand.<no memory space> [shape: f32[1,1], index: 4, kind: input, shape index: {}]   ;;  %s1438_s5 = inlined_call_operand.vmem [shape: f32[256,1], index: 5, kind: output, shape index: {}]  }
   0x1   :  { %10 = sst [smem:[#allocation2]] %s1437_s4 }
   0x2 LB: > { %s896_s21 = sadd.s32 4294967295, %s1165_s20   ;;  %p900_p0 = scmp.ge.s32.totalorder %s1165_s20, 1  ;;  %s1165_s20 = sphi %s1200_s20, %s16_s20  }
   0x3   : > { %p200_p1 = scmp.lt.s32.totalorder %s1165_s20, 3 }
   0x5   : > { %p201_p2 = pnand %p900_p0, %p200_p1 }
   0x6   : > { %v291_v0 = vld [vmem:[%s1435_s2 + $0x40] sm:$0xff] (!%p201_p2)  ;;  %v292_v1 = vld [vmem:[%s1435_s2 + $0x48] sm:$0xff] (!%p201_p2)  ;;  %s901_s27 = sshll.u32 (!%p201_p2), %s896_s21, 4  ;;  %v293_v5 = vld [vmem:[%s1435_s2 + $0x50] sm:$0xff] (!%p201_p2)  ;;  %vm299_vm0 = vcmask (!%p201_p2), 523264   ;;  %vm744_vm1 = vcmask (!%p201_p2), 261120  }
   0x7   : > { %204 = sbr.rel (%p201_p2) target bundleno = 433 (0x1b1), region = 40  ;;  %v267_v2 = vld [vmem:[%s1435_s2] sm:$0xff] (!%p201_p2)  ;;  %v1071_v3 = vpack.c.bf16 (!%p201_p2), %v292_v1, %v291_v0  ;;  %v268_v4 = vld [vmem:[%s1435_s2 + $0x8] sm:$0xff] (!%p201_p2)  ;;  %v294_v6 = vld [vmem:[%s1435_s2 + $0x58] sm:$0xff] (!%p201_p2)  ;;  %p234_p3 = scmp.lt.s32.totalorder (!%p201_p2), %s901_s27, 31  ;;  %vm811_vm2 = vcmask (!%p201_p2), 7168  }
   0x8   : > { %v1087_v7 = vpack.c.bf16 (!%p201_p2), %v268_v4, %v267_v2  ;;  %v1075_v8 = vpack.c.bf16 (!%p201_p2), %v294_v6, %v293_v5  ;;  %v269_v9 = vld [vmem:[%s1435_s2 + $0x10] sm:$0xff] (!%p201_p2)  ;;  %v270_v10 = vld [vmem:[%s1435_s2 + $0x18] sm:$0xff] (!%p201_p2)  ;;  %v295_v11 = vld [vmem:[%s1435_s2 + $0x60] sm:$0xff] (!%p201_p2)  ;;  %s793_s15 = sld [smem:[#allocation2]] (!%p201_p2) }
   0x9   : > { %1072 = vmatprep.subr.bf16.mxu1 (!%p201_p2), %v1071_v3  ;;  %v1091_v12 = vpack.c.bf16 (!%p201_p2), %v270_v10, %v269_v9  ;;  %v296_v13 = vld [vmem:[%s1435_s2 + $0x68] sm:$0xff] (!%p201_p2)  ;;  %v271_v14 = vld [vmem:[%s1435_s2 + $0x20] sm:$0xff] (!%p201_p2)  ;;  %v297_v18 = vld [vmem:[%s1435_s2 + $0x70] sm:$0xff] (!%p201_p2) }
   0xa   : > { %v272_v15 = vld [vmem:[%s1435_s2 + $0x28] sm:$0xff] (!%p201_p2)  ;;  %1088 = vmatprep.subr.bf16.mxu0 (!%p201_p2), %v1087_v7  ;;  %1074 = vmatpush3.bf16.msra.mxu1 (!%p201_p2), %v1071_v3  ;;  %v1079_v16 = vpack.c.bf16 (!%p201_p2), %v296_v13, %v295_v11  ;;  %v298_v19 = vld [vmem:[%s1435_s2 + $0x78] sm:$0xff] (!%p201_p2)  ;;  %v273_v20 = vld [vmem:[%s1435_s2 + $0x30] sm:$0xff] (!%p201_p2) }
   0xb   : > { %1090 = vmatpush3.bf16.msra.mxu0 (!%p201_p2), %v1087_v7  ;;  %1076 = vmatprep.subr.bf16.mxu1 (!%p201_p2), %v1075_v8  ;;  %v1095_v17 = vpack.c.bf16 (!%p201_p2), %v272_v15, %v271_v14  ;;  %v274_v21 = vld [vmem:[%s1435_s2 + $0x38] sm:$0xff] (!%p201_p2)  ;;  %v1083_v24 = vpack.c.bf16 (!%p201_p2), %v298_v19, %v297_v18  ;;  %v1337_v58 = vld [vmem:[%s1436_s3] ss:$0 sm:$0xff] (!%p201_p2) }
   0xc   : > { %1092 = vmatprep.subr.bf16.mxu0 (!%p201_p2), %v1091_v12  ;;  %v1099_v25 = vpack.c.bf16 (!%p201_p2), %v274_v21, %v273_v20 }
   0xe   : > { %s1440_s27 = smov (!%p234_p3, %s901_s27), 31  ;;  %1078 = vmatpush3.bf16.msra.mxu1 %v1075_v8 }
   0xf   : > { %s1244_s22 = sshll.u32 %s1440_s27, 3  ;;  %1094 = vmatpush3.bf16.msra.mxu0 %v1091_v12  ;;  %1080 = vmatprep.subr.bf16.mxu1 %v1079_v16 }
  0x10   : > { %s1259_s30 = scalar_lea.vmem %s1434_s1, %s1244_s22  ;;  %s1265_s8 = scalar_lea.vmem %s1433_s0, %s1244_s22  ;;  %1096 = vmatprep.subr.bf16.mxu0 %v1095_v17 }
  0x11   : > { %v275_v22 = vld [vmem:[%s1259_s30] sm:$0xff]  ;;  %v276_v26 = vld [vmem:[%s1259_s30 + $0x8] sm:$0xff]  ;;  %v277_v28 = vld [vmem:[%s1259_s30 + $0x10] sm:$0xff]  ;;  %s1396_s18 = scalar_lea.vmem %s1438_s5, %s1244_s22 }
  0x12   : > { %v251_v23 = vld [vmem:[%s1265_s8] sm:$0xff]  ;;  %1007 = vmatprep.mubr.msk.f32.mxu1 %vm299_vm0, %v275_v22  ;;  %1082 = vmatpush3.bf16.msra.mxu1 %v1079_v16  ;;  %v252_v27 = vld [vmem:[%s1265_s8 + $0x8] sm:$0xff]  ;;  %v253_v29 = vld [vmem:[%s1265_s8 + $0x10] sm:$0xff] }
  0x13   : > { %1047 = vmatprep.mubr.msk.f32.mxu0 %vm299_vm0, %v251_v23  ;;  %1098 = vmatpush3.bf16.msra.mxu0 %v1095_v17  ;;  %v278_v30 = vld [vmem:[%s1259_s30 + $0x18] sm:$0xff]  ;;  %v279_v32 = vld [vmem:[%s1259_s30 + $0x20] sm:$0xff]  ;;  %v280_v34 = vld [vmem:[%s1259_s30 + $0x28] sm:$0xff] }
  0x14   : > { %1084 = vmatprep.subr.bf16.mxu1 %v1083_v24  ;;  %1100 = vmatprep.subr.bf16.mxu0 %v1099_v25  ;;  %v254_v31 = vld [vmem:[%s1265_s8 + $0x18] sm:$0xff]  ;;  %v255_v33 = vld [vmem:[%s1265_s8 + $0x20] sm:$0xff]  ;;  %v256_v35 = vld [vmem:[%s1265_s8 + $0x28] sm:$0xff] }
  0x15   : > { %v281_v36 = vld [vmem:[%s1259_s30 + $0x30] sm:$0xff]  ;;  %v282_v38 = vld [vmem:[%s1259_s30 + $0x38] sm:$0xff]  ;;  %v283_v40 = vld [vmem:[%s1259_s30 + $0x40] sm:$0xff] }
  0x16   : > { %1086 = vmatpush3.bf16.msra.mxu1 %v1083_v24  ;;  %v257_v37 = vld [vmem:[%s1265_s8 + $0x30] sm:$0xff]  ;;  %v258_v39 = vld [vmem:[%s1265_s8 + $0x38] sm:$0xff]  ;;  %v259_v41 = vld [vmem:[%s1265_s8 + $0x40] sm:$0xff] }
  0x17   : > { %1102 = vmatpush3.bf16.msra.mxu0 %v1099_v25  ;;  %v284_v42 = vld [vmem:[%s1259_s30 + $0x48] sm:$0xff]  ;;  %v285_v44 = vld [vmem:[%s1259_s30 + $0x50] sm:$0xff]  ;;  %v286_v46 = vld [vmem:[%s1259_s30 + $0x58] sm:$0xff] }
  0x18   : > { %v260_v43 = vld [vmem:[%s1265_s8 + $0x48] sm:$0xff]  ;;  %v261_v45 = vld [vmem:[%s1265_s8 + $0x50] sm:$0xff]  ;;  %v262_v47 = vld [vmem:[%s1265_s8 + $0x58] sm:$0xff] }
  0x19   : > { %1008 = vmatmul.mubr.msk.f32.vlgmr.msra.gmra.mrb[0].mxu1 %vm299_vm0, %v276_v26  ;;  %v287_v48 = vld [vmem:[%s1259_s30 + $0x60] sm:$0xff]  ;;  %v288_v50 = vld [vmem:[%s1259_s30 + $0x68] sm:$0xff]  ;;  %v289_v52 = vld [vmem:[%s1259_s30 + $0x70] sm:$0xff] }
  0x1a   : > { %1048 = vmatmul.mubr.msk.f32.vlgmr.msra.gmra.mrb[0].mxu0 %vm299_vm0, %v252_v27  ;;  %1010 = vmatprep.mubr.msk.f32.mxu1 %vm299_vm0, %v277_v28  ;;  %v263_v49 = vld [vmem:[%s1265_s8 + $0x60] sm:$0xff]  ;;  %v264_v51 = vld [vmem:[%s1265_s8 + $0x68] sm:$0xff]  ;;  %v265_v53 = vld [vmem:[%s1265_s8 + $0x70] sm:$0xff] }
  0x1b   : > { %1050 = vmatprep.mubr.msk.f32.mxu0 %vm299_vm0, %v253_v29  ;;  %v290_v54 = vld [vmem:[%s1259_s30 + $0x78] sm:$0xff]  ;;  %v1348_v22 = vld [vmem:[%s1436_s3 + $0x1] ss:$0 sm:$0xff] }
  0x1c   : > { %v266_v55 = vld [vmem:[%s1265_s8 + $0x78] sm:$0xff] }
  0x1d   : > { %1011 = vmatmul.mubr.msk.f32.gmra.mrb[2].mxu1 %vm299_vm0, %v278_v30 }
  0x1e   : > { %1051 = vmatmul.mubr.msk.f32.gmra.mrb[2].mxu0 %vm299_vm0, %v254_v31  ;;  %1013 = vmatprep.mubr.msk.f32.mxu1 %vm299_vm0, %v279_v32 }
  0x1f   : > { %1053 = vmatprep.mubr.msk.f32.mxu0 %vm299_vm0, %v255_v33 }
  0x21   : > { %1014 = vmatmul.mubr.msk.f32.gmra.mrb[4].mxu1 %vm299_vm0, %v280_v34 }
  0x22   : > { %1054 = vmatmul.mubr.msk.f32.gmra.mrb[4].mxu0 %vm299_vm0, %v256_v35  ;;  %1016 = vmatprep.mubr.msk.f32.mxu1 %vm299_vm0, %v281_v36 }
  0x23   : > { %1056 = vmatprep.mubr.msk.f32.mxu0 %vm299_vm0, %v257_v37 }
  0x25   : > { %1017 = vmatmul.mubr.msk.f32.gmra.mrb[6].mxu1 %vm299_vm0, %v282_v38 }
  0x26   : > { %1057 = vmatmul.mubr.msk.f32.gmra.mrb[6].mxu0 %vm299_vm0, %v258_v39  ;;  %1019 = vmatprep.mubr.msk.f32.mxu1 %vm299_vm0, %v283_v40 }
  0x27   : > { %1059 = vmatprep.mubr.msk.f32.mxu0 %vm299_vm0, %v259_v41 }
  0x29   : > { %1020 = vmatmul.mubr.msk.f32.gmra.mrb[8].mxu1 %vm299_vm0, %v284_v42 }
  0x2a   : > { %1060 = vmatmul.mubr.msk.f32.gmra.mrb[8].mxu0 %vm299_vm0, %v260_v43  ;;  %1022 = vmatprep.mubr.msk.f32.mxu1 %vm299_vm0, %v285_v44 }
  0x2b   : > { %1062 = vmatprep.mubr.msk.f32.mxu0 %vm299_vm0, %v261_v45 }
  0x2d   : > { %1023 = vmatmul.mubr.msk.f32.gmra.mrb[10].mxu1 %vm299_vm0, %v286_v46 }
  0x2e   : > { %1063 = vmatmul.mubr.msk.f32.gmra.mrb[10].mxu0 %vm299_vm0, %v262_v47  ;;  %1025 = vmatprep.mubr.msk.f32.mxu1 %vm299_vm0, %v287_v48 }
  0x2f   : > { %1065 = vmatprep.mubr.msk.f32.mxu0 %vm299_vm0, %v263_v49 }
  0x31   : > { %1026 = vmatmul.mubr.msk.f32.gmra.mrb[12].mxu1 %vm299_vm0, %v288_v50 }
  0x32   : > { %1066 = vmatmul.mubr.msk.f32.gmra.mrb[12].mxu0 %vm299_vm0, %v264_v51  ;;  %1028 = vmatprep.mubr.msk.f32.mxu1 %vm299_vm0, %v289_v52 }
  0x33   : > { %1068 = vmatprep.mubr.msk.f32.mxu0 %vm299_vm0, %v265_v53 }
  0x35   : > { %1029 = vmatmul.mubr.msk.f32.gmra.mrb[14].mxu1 %vm299_vm0, %v290_v54 }
  0x36   : > { %1069 = vmatmul.mubr.msk.f32.gmra.mrb[14].mxu0 %vm299_vm0, %v266_v55 }
  0xec   : > { %v1009_v56 = vpop.f32.mrb[0].mxu1 }
  0xed   : > { %v1049_v57 = vpop.f32.mrb[0].mxu0  ;;  %v414_v59 = vpop.f32.mrb[1].mxu1 }
  0xee   : > { %v613_v60 = vadd.f32 %v1049_v57, %v1009_v56  ;;  %v607_v61 = vpop.f32.mrb[1].mxu0 }
  0xef   : > { %v608_v62 = vadd.f32 %v607_v61, %v414_v59 }
  0xf0   : > { %v692_v63 = vadd.f32 %v1337_v58, %v613_v60  ;;  %v1012_v0 = vpop.f32.mrb[2].mxu1 }
  0xf1   : > { %v691_v1 = vadd.f32 %v1337_v58, %v608_v62  ;;  %v1052_v2 = vpop.f32.mrb[2].mxu0  ;;  %v424_v3 = vpop.f32.mrb[3].mxu1 }
  0xf2   : > { %1127 = vtanh.f32 %v692_v63  ;;  %v623_v4 = vadd.f32 %v1052_v2, %v1012_v0  ;;  %v617_v5 = vpop.f32.mrb[3].mxu0 }
  0xf3   : > { %1129 = vtanh.f32 %v691_v1  ;;  %v618_v6 = vadd.f32 %v617_v5, %v424_v3 }
  0xf4   : > { %v694_v7 = vadd.f32 %v1337_v58, %v623_v4  ;;  %v1015_v8 = vpop.f32.mrb[4].mxu1 }
  0xf5   : > { %v693_v9 = vadd.f32 %v1337_v58, %v618_v6  ;;  %v1055_v10 = vpop.f32.mrb[4].mxu0  ;;  %v434_v11 = vpop.f32.mrb[5].mxu1 }
  0xf6   : > { %1131 = vtanh.f32 %v694_v7  ;;  %v633_v12 = vadd.f32 %v1055_v10, %v1015_v8  ;;  %v627_v13 = vpop.f32.mrb[5].mxu0 }
  0xf7   : > { %1133 = vtanh.f32 %v693_v9  ;;  %v628_v14 = vadd.f32 %v627_v13, %v434_v11 }
  0xf8   : > { %v696_v15 = vadd.f32 %v1337_v58, %v633_v12  ;;  %v1018_v16 = vpop.f32.mrb[6].mxu1 }
  0xf9   : > { %v695_v17 = vadd.f32 %v1337_v58, %v628_v14  ;;  %v1058_v18 = vpop.f32.mrb[6].mxu0  ;;  %v444_v19 = vpop.f32.mrb[7].mxu1 }
  0xfa   : > { %1135 = vtanh.f32 %v696_v15  ;;  %v643_v20 = vadd.f32 %v1058_v18, %v1018_v16  ;;  %v637_v21 = vpop.f32.mrb[7].mxu0 }
  0xfb   : > { %1137 = vtanh.f32 %v695_v17  ;;  %v638_v23 = vadd.f32 %v637_v21, %v444_v19 }
  0xfc   : > { %v1128_v24 = vpop.eup %1127  ;;  %v698_v25 = vadd.f32 %v1337_v58, %v643_v20  ;;  %v1021_v26 = vpop.f32.mrb[8].mxu1 }
  0xfd   : > { %v1130_v27 = vpop.eup %1129  ;;  %v697_v28 = vadd.f32 %v1337_v58, %v638_v23  ;;  %v1061_v29 = vpop.f32.mrb[8].mxu0  ;;  %v729_v31 = vmul.f32 %v1128_v24, %v1348_v22 }
  0xfe   : > { %v454_v30 = vpop.f32.mrb[9].mxu1  ;;  %1139 = vtanh.f32 %v698_v25  ;;  %v653_v32 = vadd.f32 %v1061_v29, %v1021_v26  ;;  %v647_v33 = vpop.f32.mrb[9].mxu0  ;;  %v728_v34 = vmul.f32 %v1130_v27, %v1348_v22 }
  0xff   : > { %1141 = vtanh.f32 %v697_v28  ;;  %v748_v35 = vsel %vm744_vm1, %v729_v31, 0.0  ;;  %v648_v36 = vadd.f32 %v647_v33, %v454_v30 }
 0x100   : > { %v1132_v37 = vpop.eup %1131  ;;  %v700_v38 = vadd.f32 %v1337_v58, %v653_v32  ;;  %749 = vadd.xlane.f32.xlu0 %v748_v35  ;;  %v1024_v39 = vpop.f32.mrb[10].mxu1  ;;  %v745_v47 = vsel %vm744_vm1, %v728_v34, 0.0 }
 0x101   : > { %v1134_v40 = vpop.eup %1133  ;;  %v699_v41 = vadd.f32 %v1337_v58, %v648_v36  ;;  %v1064_v42 = vpop.f32.mrb[10].mxu0  ;;  %v731_v44 = vmul.f32 %v1132_v37, %v1348_v22 }
 0x102   : > { %v464_v43 = vpop.f32.mrb[11].mxu1  ;;  %1143 = vtanh.f32 %v700_v38  ;;  %v663_v45 = vadd.f32 %v1064_v42, %v1024_v39  ;;  %v657_v46 = vpop.f32.mrb[11].mxu0  ;;  %v730_v50 = vmul.f32 %v1134_v40, %v1348_v22 }
 0x103   : > { %1145 = vtanh.f32 %v699_v41  ;;  %v754_v48 = vsel %vm744_vm1, %v731_v44, 0.0  ;;  %v658_v49 = vadd.f32 %v657_v46, %v464_v43  ;;  %v794_v43 = vstv %s793_s15 }
 0x104   : > { %v1136_v51 = vpop.eup %1135  ;;  %v702_v52 = vadd.f32 %v1337_v58, %v663_v45  ;;  %755 = vadd.xlane.f32.xlu1 %v754_v48  ;;  %746 = vadd.xlane.f32.xlu0 %v745_v47  ;;  %v1027_v53 = vpop.f32.mrb[12].mxu1  ;;  %v751_v0 = vsel %vm744_vm1, %v730_v50, 0.0 }
 0x105   : > { %v1138_v54 = vpop.eup %1137  ;;  %v701_v55 = vadd.f32 %v1337_v58, %v658_v49  ;;  %v1067_v56 = vpop.f32.mrb[12].mxu0  ;;  %v733_v59 = vmul.f32 %v1136_v51, %v1348_v22 }
 0x106   : > { %v474_v57 = vpop.f32.mrb[13].mxu1  ;;  %1147 = vtanh.f32 %v702_v52  ;;  %v673_v60 = vadd.f32 %v1067_v56, %v1027_v53  ;;  %v667_v61 = vpop.f32.mrb[13].mxu0  ;;  %v732_v62 = vmul.f32 %v1138_v54, %v1348_v22 }
 0x107   : > { %1149 = vtanh.f32 %v701_v55  ;;  %v668_v63 = vadd.f32 %v667_v61, %v474_v57  ;;  %v760_v9 = vsel %vm744_vm1, %v733_v59, 0.0 }
 0x108   : > { %v1140_v1 = vpop.eup %1139  ;;  %v704_v2 = vadd.f32 %v1337_v58, %v673_v60  ;;  %752 = vadd.xlane.f32.xlu1 %v751_v0  ;;  %v1030_v3 = vpop.f32.mrb[14].mxu1  ;;  %v757_v4 = vsel %vm744_vm1, %v732_v62, 0.0 }
 0x109   : > { %v1142_v5 = vpop.eup %1141  ;;  %v703_v6 = vadd.f32 %v1337_v58, %v668_v63  ;;  %v1070_v7 = vpop.f32.mrb[14].mxu0  ;;  %758 = vadd.xlane.f32.xlu0 %v757_v4  ;;  %v735_v10 = vmul.f32 %v1140_v1, %v1348_v22 }
 0x10a   : > { %v484_v8 = vpop.f32.mrb[15].mxu1  ;;  %1151 = vtanh.f32 %v704_v2  ;;  %v683_v11 = vadd.f32 %v1070_v7, %v1030_v3  ;;  %v677_v12 = vpop.f32.mrb[15].mxu0  ;;  %v734_v13 = vmul.f32 %v1142_v5, %v1348_v22 }
 0x10b   : > { %1153 = vtanh.f32 %v703_v6  ;;  %v678_v14 = vadd.f32 %v677_v12, %v484_v8  ;;  %v766_v20 = vsel %vm744_vm1, %v735_v10, 0.0 }
 0x10c   : > { %v1144_v15 = vpop.eup %1143  ;;  %v706_v16 = vadd.f32 %v1337_v58, %v683_v11  ;;  %761 = vadd.xlane.f32.xlu1 %v760_v9  ;;  %v763_v17 = vsel %vm744_vm1, %v734_v13, 0.0 }
 0x10d   : > { %v1146_v18 = vpop.eup %1145  ;;  %v705_v19 = vadd.f32 %v1337_v58, %v678_v14  ;;  %764 = vadd.xlane.f32.xlu0 %v763_v17  ;;  %v737_v21 = vmul.f32 %v1144_v15, %v1348_v22 }
 0x10e   : > { %1155 = vtanh.f32 %v706_v16  ;;  %v736_v23 = vmul.f32 %v1146_v18, %v1348_v22 }
 0x10f   : > { %1157 = vtanh.f32 %v705_v19  ;;  %v772_v27 = vsel %vm744_vm1, %v737_v21, 0.0 }
 0x110   : > { %v1148_v24 = vpop.eup %1147  ;;  %767 = vadd.xlane.f32.xlu1 %v766_v20  ;;  %v769_v25 = vsel %vm744_vm1, %v736_v23, 0.0 }
 0x111   : > { %v1150_v26 = vpop.eup %1149  ;;  %770 = vadd.xlane.f32.xlu0 %v769_v25  ;;  %v739_v28 = vmul.f32 %v1148_v24, %v1348_v22 }
 0x112   : > { %v738_v58 = vmul.f32 %v1150_v26, %v1348_v22 }
 0x113   : > { %v778_v32 = vsel %vm744_vm1, %v739_v28, 0.0 }
 0x114   : > { %v1152_v29 = vpop.eup %1151  ;;  %773 = vadd.xlane.f32.xlu1 %v772_v27  ;;  %v775_v30 = vsel %vm744_vm1, %v738_v58, 0.0 }
 0x115   : > { %v1154_v31 = vpop.eup %1153  ;;  %776 = vadd.xlane.f32.xlu0 %v775_v30  ;;  %v741_v33 = vmul.f32 %v1152_v29, %v1348_v22 }
 0x116   : > { %v740_v34 = vmul.f32 %v1154_v31, %v1348_v22 }
 0x117   : > { %v784_v38 = vsel %vm744_vm1, %v741_v33, 0.0 }
 0x118   : > { %v1156_v35 = vpop.eup %1155  ;;  %779 = vadd.xlane.f32.xlu1 %v778_v32  ;;  %v781_v36 = vsel %vm744_vm1, %v740_v34, 0.0 }
 0x119   : > { %v1158_v37 = vpop.eup %1157  ;;  %782 = vadd.xlane.f32.xlu0 %v781_v36  ;;  %v743_v39 = vmul.f32 %v1156_v35, %v1348_v22 }
 0x11a   : > { %v742_v40 = vmul.f32 %v1158_v37, %v1348_v22 }
 0x11b   : > { %v790_v42 = vsel %vm744_vm1, %v743_v39, 0.0 }
 0x11c   : > { %785 = vadd.xlane.f32.xlu1 %v784_v38  ;;  %v787_v41 = vsel %vm744_vm1, %v742_v40, 0.0 }
 0x11d   : > { %788 = vadd.xlane.f32.xlu0 %v787_v41 }
 0x120   : > { %791 = vadd.xlane.f32.xlu1 %v790_v42 }
 0x18d   : > { %v750_v22 = vpop.xlane.xlu0 %749 }
 0x18e   : > { %v796_v44 = vadd.f32 %v794_v43, %v750_v22 }
 0x190   : > { %813 = vst.msk [vmem:[%s1396_s18 + $0x8] sm:$0xff] %vm811_vm2, %v796_v44 }
 0x191   : > { %v756_v45 = vpop.xlane.xlu1 %755  ;;  %v747_v46 = vpop.xlane.xlu0 %746 }
 0x192   : > { %v798_v47 = vadd.f32 %v794_v43, %v756_v45  ;;  %v795_v48 = vadd.f32 %v794_v43, %v747_v46 }
 0x194   : > { %815 = vst.msk [vmem:[%s1396_s18 + $0x18] sm:$0xff] %vm811_vm2, %v798_v47  ;;  %812 = vst.msk [vmem:[%s1396_s18] sm:$0xff] %vm811_vm2, %v795_v48 }
 0x195   : > { %v753_v49 = vpop.xlane.xlu1 %752 }
 0x196   : > { %v797_v50 = vadd.f32 %v794_v43, %v753_v49  ;;  %v759_v51 = vpop.xlane.xlu0 %758 }
 0x197   : > { %v799_v52 = vadd.f32 %v794_v43, %v759_v51 }
 0x198   : > { %814 = vst.msk [vmem:[%s1396_s18 + $0x10] sm:$0xff] %vm811_vm2, %v797_v50 }
 0x199   : > { %816 = vst.msk [vmem:[%s1396_s18 + $0x20] sm:$0xff] %vm811_vm2, %v799_v52  ;;  %v762_v53 = vpop.xlane.xlu1 %761 }
 0x19a   : > { %v800_v54 = vadd.f32 %v794_v43, %v762_v53  ;;  %v765_v55 = vpop.xlane.xlu0 %764 }
 0x19b   : > { %v801_v56 = vadd.f32 %v794_v43, %v765_v55 }
 0x19c   : > { %817 = vst.msk [vmem:[%s1396_s18 + $0x28] sm:$0xff] %vm811_vm2, %v800_v54 }
 0x19d   : > { %818 = vst.msk [vmem:[%s1396_s18 + $0x30] sm:$0xff] %vm811_vm2, %v801_v56  ;;  %v768_v57 = vpop.xlane.xlu1 %767 }
 0x19e   : > { %v802_v59 = vadd.f32 %v794_v43, %v768_v57  ;;  %v771_v60 = vpop.xlane.xlu0 %770 }
 0x19f   : > { %v803_v61 = vadd.f32 %v794_v43, %v771_v60 }
 0x1a0   : > { %819 = vst.msk [vmem:[%s1396_s18 + $0x38] sm:$0xff] %vm811_vm2, %v802_v59 }
 0x1a1   : > { %820 = vst.msk [vmem:[%s1396_s18 + $0x40] sm:$0xff] %vm811_vm2, %v803_v61  ;;  %v774_v62 = vpop.xlane.xlu1 %773 }
 0x1a2   : > { %v804_v63 = vadd.f32 %v794_v43, %v774_v62  ;;  %v777_v0 = vpop.xlane.xlu0 %776 }
 0x1a3   : > { %v805_v1 = vadd.f32 %v794_v43, %v777_v0 }
 0x1a4   : > { %821 = vst.msk [vmem:[%s1396_s18 + $0x48] sm:$0xff] %vm811_vm2, %v804_v63 }
 0x1a5   : > { %822 = vst.msk [vmem:[%s1396_s18 + $0x50] sm:$0xff] %vm811_vm2, %v805_v1  ;;  %v780_v2 = vpop.xlane.xlu1 %779 }
 0x1a6   : > { %v806_v3 = vadd.f32 %v794_v43, %v780_v2  ;;  %v783_v4 = vpop.xlane.xlu0 %782 }
 0x1a7   : > { %v807_v5 = vadd.f32 %v794_v43, %v783_v4 }
 0x1a8   : > { %823 = vst.msk [vmem:[%s1396_s18 + $0x58] sm:$0xff] %vm811_vm2, %v806_v3 }
 0x1a9   : > { %824 = vst.msk [vmem:[%s1396_s18 + $0x60] sm:$0xff] %vm811_vm2, %v807_v5  ;;  %v786_v6 = vpop.xlane.xlu1 %785 }
 0x1aa   : > { %v808_v7 = vadd.f32 %v794_v43, %v786_v6  ;;  %v789_v8 = vpop.xlane.xlu0 %788 }
 0x1ab   : > { %v809_v9 = vadd.f32 %v794_v43, %v789_v8 }
 0x1ac   : > { %825 = vst.msk [vmem:[%s1396_s18 + $0x68] sm:$0xff] %vm811_vm2, %v808_v7 }
 0x1ad   : > { %826 = vst.msk [vmem:[%s1396_s18 + $0x70] sm:$0xff] %vm811_vm2, %v809_v9  ;;  %v792_v10 = vpop.xlane.xlu1 %791 }
 0x1ae   : > { %v810_v11 = vadd.f32 %v794_v43, %v792_v10 }
 0x1b0   : > { %827 = vst.msk [vmem:[%s1396_s18 + $0x78] sm:$0xff] %vm811_vm2, %v810_v11 }
 0x1b1 PF: > { %s16_s20 = sadd.s32 1, %s1165_s20  }
 0x1b2   : > { %p13_p4 = scmp.ge.s32.totalorder %s16_s20, 4  }
 0x1b4   :  { %15 = sbr.rel (!%p13_p4) target bundleno = 2 (0x2), region = 73 }

</bundles_post_ra>
